<compile_context>
chip_gen: v7x
topology: tpu7x:2x2x1
jax: 0.10.0
libtpu: 0.0.40
codegen_flags: <defaults>
</compile_context>

<pallas_src>
import functools

import jax
import jax.numpy as jnp
from jax.experimental import pallas as pl
from jax.experimental.pallas import tpu as pltpu

KS_LIST = (2, 3, 4, 5)     # the four Block kernel sizes
KS_MAX = max(KS_LIST)
LANE = 128


def _round_up(x, m):
    return (x + m - 1) // m * m


def textcnn_kernel(emb_ref, w_ref, b_ref, vlen_ref, wc_ref, bc_ref, out_ref,
                   *, t_max):
    """Fused TextCNN forward on one batch tile.

    emb_ref : (TB, L_pad, E)        bf16  zero-padded token embeddings
    w_ref   : (KS_MAX*E, N_TAP)     bf16  im2col conv weight: rows [k*E,(k+1)*E)
                                          hold tap k of every branch; branch bi
                                          occupies lanes [bi*H,(bi+1)*H)
    b_ref   : (1, N_TAP)            f32   conv biases, branch-major, 0 in pad lanes
    vlen_ref: (1, N_TAP)            i32   valid l_out per column (0 in pad lanes)
    wc_ref  : (N_TAP, C_PAD)        bf16  classifier weight, zero-padded
    bc_ref  : (1, C_PAD)            f32   classifier bias, -1e30 in pad classes
    out_ref : (1, TB)               i32   argmax class index per row (lane-dense)
    """
    tb, l_pad, e = emb_ref.shape
    n_tap = b_ref.shape[1]

    emb = emb_ref[...]                                            # (TB, L_pad, E)

    # im2col over the contraction axis: concatenate the KS_MAX time-shifted
    # views on the lane axis -> one MXU matmul with K = KS_MAX*E, N = n_tap.
    x = jnp.concatenate([emb[:, k:k + t_max, :] for k in range(KS_MAX)],
                        axis=-1)                                  # (TB, T, KS_MAX*E)
    x2d = x.reshape(tb * t_max, KS_MAX * e)
    p = jnp.dot(x2d, w_ref[...], preferred_element_type=jnp.float32)
    acc = p.reshape(tb, t_max, n_tap)                             # (TB, T, N_TAP)

    # Fused bias -> ReLU -> mask invalid time positions -> max-pool over time.
    # Post-ReLU values are >= 0 and every real branch has >= 1 valid position,
    # so masking with 0.0 never wins the max.
    acc = jnp.maximum(acc + b_ref[...], 0.0)
    t_iota = jax.lax.broadcasted_iota(jnp.int32, (1, t_max, n_tap), 1)
    valid = t_iota < vlen_ref[...]                                # (1, T, N_TAP)
    feat = jnp.max(jnp.where(valid, acc, 0.0), axis=1)            # (TB, N_TAP)

    # Classifier + in-kernel argmax (pad classes carry bias -1e30, never win).
    logits = jnp.dot(feat.astype(wc_ref.dtype), wc_ref[...],
                     preferred_element_type=jnp.float32) + bc_ref[...]
    m = jnp.max(logits, axis=-1, keepdims=True)
    col = jax.lax.broadcasted_iota(jnp.int32, logits.shape, 1)
    idx = jnp.min(jnp.where(logits == m, col, jnp.int32(2 ** 30)), axis=-1)
    out_ref[...] = idx.reshape(1, tb)


def make_params(key, vocab_size, emb_num, max_len, hidden_num, class_num):
    """Deterministic synthetic parameters matching the PyTorch module shapes."""
    keys = jax.random.split(key, 12)
    params = {
        # nn.Embedding(vocab_size, emb_num)
        'emb_table': jax.random.normal(keys[0], (vocab_size, emb_num), jnp.float32) * 0.1,
        # nn.Linear(hidden_num * 4, class_num): torch weight is (C, 4H); stored transposed.
        'wc': jax.random.normal(keys[1], (hidden_num * 4, class_num), jnp.float32) * 0.1,
        'bc': (jax.random.normal(keys[2], (class_num,), jnp.float32) * 0.1).reshape(1, -1),
    }
    # Conv2d(1, hidden, (ks, emb_num)): torch weight (H, 1, ks, E) -> stored (ks, E, H).
    for i, ks in enumerate(KS_LIST):
        w = jax.random.normal(keys[3 + 2 * i], (hidden_num, 1, ks, emb_num), jnp.float32) * 0.1
        b = jax.random.normal(keys[4 + 2 * i], (hidden_num,), jnp.float32) * 0.1
        params[f'w{ks}'] = jnp.transpose(w[:, 0, :, :], (1, 2, 0))   # (ks, E, H)
        params[f'b{ks}'] = b.reshape(1, -1)                          # (1, H)
    return params


def fuse_params(params, max_len):
    """Pre-fuse conv taps / biases / classifier into compact lane-dense tensors (ONCE)."""
    emb_num = params['emb_table'].shape[1]
    hidden = params['b2'].shape[-1]
    class_num = params['wc'].shape[1]
    n_tap = _round_up(len(KS_LIST) * hidden, LANE)      # output lanes of the conv matmul
    c_pad = _round_up(class_num, LANE)

    # im2col-over-K weight: (KS_MAX*E, n_tap).  Taps k >= ks of a branch are 0.
    w_all = jnp.zeros((KS_MAX * emb_num, n_tap), jnp.float32)
    b_all = jnp.zeros((1, n_tap), jnp.float32)
    vlen = jnp.zeros((1, n_tap), jnp.int32)
    wc_pad = jnp.zeros((n_tap, c_pad), jnp.float32)
    bc_pad = jnp.full((1, c_pad), -1e30, jnp.float32)

    for bi, ks in enumerate(KS_LIST):
        w = params[f'w{ks}']                                # (ks, E, H)
        for k in range(ks):
            w_all = w_all.at[k * emb_num:(k + 1) * emb_num,
                             bi * hidden:(bi + 1) * hidden].set(w[k])
        b_all = b_all.at[0, bi * hidden:(bi + 1) * hidden].set(params[f'b{ks}'][0])
        vlen = vlen.at[0, bi * hidden:(bi + 1) * hidden].set(max_len - ks + 1)
        wc_pad = wc_pad.at[bi * hidden:(bi + 1) * hidden, :class_num].set(
            params['wc'][bi * hidden:(bi + 1) * hidden])
    bc_pad = bc_pad.at[0, :class_num].set(params['bc'][0])

    return {
        'emb_table': params['emb_table'],
        'w_all': w_all.astype(jnp.bfloat16),
        'b_all': b_all,
        'vlen': vlen,
        'wc_pad': wc_pad.astype(jnp.bfloat16),
        'bc_pad': bc_pad,
        'n_tap': n_tap,
        'c_pad': c_pad,
    }


def textcnn_forward(batch_idx, fused, *, batch_tile=256):
    """batch_idx: (B, 1, max_len) int -> predicted class indices (B,) int32."""
    # TODO(synk): the embedding gather stays in plain JAX glue; for large
    # vocab/batch move it in-kernel via scalar-prefetched token ids + DMA gather.
    emb = fused['emb_table'][batch_idx[:, 0, :]].astype(jnp.bfloat16)   # (B, L, E)
    b, l, e = emb.shape
    n_tap = fused['n_tap']
    c_pad = fused['c_pad']

    # Max-pool window rows (M of the conv matmul); 16-aligned for bf16 sublane tile.
    t_max = _round_up(l - min(KS_LIST) + 1, 16)
    # Time rows touched by the im2col slices (only costs embedding DMA, not FLOPs).
    l_pad = _round_up(t_max + KS_MAX - 1, 8)

    # Batch tile: multiple of 128 when gridded so the (1, tb) output block is
    # lane-dense/legal; small batches take a single full-size block.
    if b <= batch_tile:
        tb = _round_up(b, 8)
    else:
        tb = _round_up(batch_tile, LANE)
    b_pad = _round_up(b, tb)
    grid_n = b_pad // tb

    emb = jnp.pad(emb, ((0, b_pad - b), (0, l_pad - l), (0, 0)))

    # Explicit scoped-VMEM budget (per grid step, with headroom): double-buffered
    # emb tile + im2col slab + f32 conv activations + weights.  At tb=256 this is
    # only a few MiB, so it fits v5e/v6e/v7x scoped limits comfortably.
    vmem_need = (
        2 * tb * l_pad * e * 2                 # emb tile, double buffered (bf16)
        + 2 * tb * t_max * KS_MAX * e * 2      # im2col slices + concat (bf16)
        + 2 * tb * t_max * n_tap * 4           # f32 conv activations (+ headroom)
        + 2 * (KS_MAX * e * n_tap + n_tap * c_pad) * 2   # weights (bf16)
        + 8 * (n_tap + c_pad) * 4              # small vectors
        + 2 * tb * 4                           # output row
    )
    vmem_limit = int(min(max(2 * vmem_need, 32 << 20), 48 << 20))

    const2 = lambda i: (0, 0)
    out = pl.pallas_call(
        functools.partial(textcnn_kernel, t_max=t_max),
        out_shape=jax.ShapeDtypeStruct((1, b_pad), jnp.int32),
        grid=(grid_n,),
        in_specs=[
            pl.BlockSpec((tb, l_pad, e), lambda i: (i, 0, 0)),
            pl.BlockSpec((KS_MAX * e, n_tap), const2),
            pl.BlockSpec((1, n_tap), const2),
            pl.BlockSpec((1, n_tap), const2),
            pl.BlockSpec((n_tap, c_pad), const2),
            pl.BlockSpec((1, c_pad), const2),
        ],
        out_specs=pl.BlockSpec((1, tb), lambda i: (0, i)),
        compiler_params=pltpu.CompilerParams(
            dimension_semantics=("parallel",),
            vmem_limit_bytes=vmem_limit),
    )(emb, fused['w_all'], fused['b_all'], fused['vlen'],
      fused['wc_pad'], fused['bc_pad'])

    return out[0, :b]


if __name__ == "__main__":
    # Small, module-consistent shapes.
    vocab_size, emb_num, max_len, hidden_num, class_num = 50, 32, 16, 16, 8
    batch = 4

    key = jax.random.PRNGKey(0)
    k_param, k_idx = jax.random.split(key)
    params = make_params(k_param, vocab_size, emb_num, max_len, hidden_num, class_num)
    fused = fuse_params(params, max_len)            # weight fusion done once, outside the call

    # batch_idx mirrors the dataset output: (B, 1, max_len) token ids.
    batch_idx = jax.random.randint(k_idx, (batch, 1, max_len), 0, vocab_size, jnp.int32)

    preds = textcnn_forward(batch_idx, fused)
    jax.block_until_ready(preds)

    # Pure-JAX reference of the same math (operands rounded to bf16 exactly like
    # the kernel, f32 accumulation).
    emb = params['emb_table'][batch_idx[:, 0, :]].astype(jnp.bfloat16).astype(jnp.float32)
    feats = []
    for ks in KS_LIST:
        w = params[f'w{ks}'].astype(jnp.bfloat16).astype(jnp.float32)   # (ks, E, H)
        l_out = max_len - ks + 1
        acc = sum(jnp.einsum('ble,eh->blh', emb[:, k:k + l_out, :], w[k])
                  for k in range(ks)) + params[f'b{ks}'][0]
        feats.append(jnp.max(jnp.maximum(acc, 0.0), axis=1))
    feat = jnp.concatenate(feats, axis=1).astype(jnp.bfloat16).astype(jnp.float32)
    wc = params['wc'].astype(jnp.bfloat16).astype(jnp.float32)
    ref_logits = feat @ wc + params['bc'][0]
    ref_preds = jnp.argmax(ref_logits, axis=-1).astype(jnp.int32)

    # Tie-tolerant argmax check: the kernel's single K=160 MXU matmul accumulates
    # in a different order than the reference sum-of-einsums, so exactly tied
    # logits may legitimately resolve to a different (equally optimal) class.
    picked = jnp.take_along_axis(ref_logits, preds[:, None], axis=-1)[:, 0]
    best = jnp.max(ref_logits, axis=-1)
    assert bool(jnp.all(picked >= best - 1e-3)), (preds, ref_preds, ref_logits)

    print("KERNEL_OK")
</pallas_src>

<mosaic_0001>
module attributes {stable_mosaic.version = 11 : i64} {
  func.func @textcnn_kernel(%arg0: i32, %arg1: memref<8x24x32xbf16, #tpu.memory_space<vmem>>, %arg2: memref<160x128xbf16, #tpu.memory_space<vmem>>, %arg3: memref<1x128xf32, #tpu.memory_space<vmem>>, %arg4: memref<1x128xi32, #tpu.memory_space<vmem>>, %arg5: memref<128x128xbf16, #tpu.memory_space<vmem>>, %arg6: memref<1x128xf32, #tpu.memory_space<vmem>>, %arg7: memref<1x8xi32, #tpu.memory_space<vmem>>) attributes {dimension_semantics = [#tpu.dimension_semantics<parallel>], iteration_bounds = array<i64: 1>, scalar_prefetch = 0 : i64, scratch_operands = 0 : i64, tpu.core_type = #tpu.core_type<tc>, window_params = [{transform_indices = @transform_0, window_bounds = array<i64: 8, 24, 32>}, {pipeline_mode = #tpu.pipeline_mode<synchronous>, transform_indices = @transform_1, window_bounds = array<i64: 160, 128>}, {pipeline_mode = #tpu.pipeline_mode<synchronous>, transform_indices = @transform_2, window_bounds = array<i64: 1, 128>}, {pipeline_mode = #tpu.pipeline_mode<synchronous>, transform_indices = @transform_3, window_bounds = array<i64: 1, 128>}, {pipeline_mode = #tpu.pipeline_mode<synchronous>, transform_indices = @transform_4, window_bounds = array<i64: 128, 128>}, {pipeline_mode = #tpu.pipeline_mode<synchronous>, transform_indices = @transform_5, window_bounds = array<i64: 1, 128>}, {transform_indices = @transform_6, window_bounds = array<i64: 1, 8>}]} {
    %c0 = arith.constant 0 : index
    %c0_0 = arith.constant 0 : index
    %c0_1 = arith.constant 0 : index
    %0 = vector.load %arg1[%c0, %c0_0, %c0_1] : memref<8x24x32xbf16, #tpu.memory_space<vmem>>, vector<8x24x32xbf16>
    %1 = vector.extract_strided_slice %0 {offsets = [0, 0, 0], sizes = [8, 16, 32], strides = [1, 1, 1]} : vector<8x24x32xbf16> to vector<8x16x32xbf16>
    %2 = vector.extract_strided_slice %0 {offsets = [0, 1, 0], sizes = [8, 16, 32], strides = [1, 1, 1]} : vector<8x24x32xbf16> to vector<8x16x32xbf16>
    %3 = vector.extract_strided_slice %0 {offsets = [0, 2, 0], sizes = [8, 16, 32], strides = [1, 1, 1]} : vector<8x24x32xbf16> to vector<8x16x32xbf16>
    %4 = vector.extract_strided_slice %0 {offsets = [0, 3, 0], sizes = [8, 16, 32], strides = [1, 1, 1]} : vector<8x24x32xbf16> to vector<8x16x32xbf16>
    %5 = vector.extract_strided_slice %0 {offsets = [0, 4, 0], sizes = [8, 16, 32], strides = [1, 1, 1]} : vector<8x24x32xbf16> to vector<8x16x32xbf16>
    %6 = tpu.concatenate %1, %2, %3, %4, %5 in 2 : vector<8x16x32xbf16>, vector<8x16x32xbf16>, vector<8x16x32xbf16>, vector<8x16x32xbf16>, vector<8x16x32xbf16> -> vector<8x16x160xbf16>
    %7 = vector.shape_cast %6 : vector<8x16x160xbf16> to vector<128x160xbf16>
    %c0_2 = arith.constant 0 : index
    %c0_3 = arith.constant 0 : index
    %8 = vector.load %arg2[%c0_2, %c0_3] : memref<160x128xbf16, #tpu.memory_space<vmem>>, vector<160x128xbf16>
    %cst = arith.constant dense<0.000000e+00> : vector<128x128xf32>
    %9 = tpu.matmul %7, %8, %cst {dimension_numbers = #tpu.dot_dimension_numbers<[1], [0], [0], [1], [0, 0, 1, 1], [], []>} : vector<128x160xbf16>, vector<160x128xbf16>, vector<128x128xf32> -> vector<128x128xf32>
    %10 = vector.shape_cast %9 : vector<128x128xf32> to vector<8x16x128xf32>
    %c0_4 = arith.constant 0 : index
    %c0_5 = arith.constant 0 : index
    %11 = vector.load %arg3[%c0_4, %c0_5] : memref<1x128xf32, #tpu.memory_space<vmem>>, vector<1x128xf32>
    %12 = vector.shape_cast %11 : vector<1x128xf32> to vector<1x1x128xf32>
    %13 = vector.broadcast %12 : vector<1x1x128xf32> to vector<8x16x128xf32>
    %14 = arith.addf %10, %13 : vector<8x16x128xf32>
    %cst_6 = arith.constant 0.000000e+00 : f32
    %15 = vector.broadcast %cst_6 : f32 to vector<8x16x128xf32>
    %16 = arith.maximumf %14, %15 : vector<8x16x128xf32>
    %17 = tpu.iota {dimensions = array<i32: 1>} : vector<1x16x128xi32>
    %c0_7 = arith.constant 0 : index
    %c0_8 = arith.constant 0 : index
    %18 = vector.load %arg4[%c0_7, %c0_8] : memref<1x128xi32, #tpu.memory_space<vmem>>, vector<1x128xi32>
    %19 = vector.shape_cast %18 : vector<1x128xi32> to vector<1x1x128xi32>
    %20 = vector.broadcast %19 : vector<1x1x128xi32> to vector<1x16x128xi32>
    %21 = arith.cmpi slt, %17, %20 : vector<1x16x128xi32>
    %cst_9 = arith.constant 0.000000e+00 : f32
    %22 = vector.shape_cast %21 : vector<1x16x128xi1> to vector<1x16x128xi1>
    %23 = vector.broadcast %22 : vector<1x16x128xi1> to vector<8x16x128xi1>
    %24 = vector.broadcast %cst_9 : f32 to vector<8x16x128xf32>
    %25 = arith.select %23, %16, %24 : vector<8x16x128xi1>, vector<8x16x128xf32>
    %cst_10 = arith.constant dense<0xFF800000> : vector<8x128xf32>
    %26 = vector.multi_reduction <maximumf>, %25, %cst_10 [1] : vector<8x16x128xf32> to vector<8x128xf32>
    %27 = arith.truncf %26 : vector<8x128xf32> to vector<8x128xbf16>
    %c0_11 = arith.constant 0 : index
    %c0_12 = arith.constant 0 : index
    %28 = vector.load %arg5[%c0_11, %c0_12] : memref<128x128xbf16, #tpu.memory_space<vmem>>, vector<128x128xbf16>
    %cst_13 = arith.constant dense<0.000000e+00> : vector<8x128xf32>
    %29 = tpu.matmul %27, %28, %cst_13 {dimension_numbers = #tpu.dot_dimension_numbers<[1], [0], [0], [1], [0, 0, 1, 1], [], []>} : vector<8x128xbf16>, vector<128x128xbf16>, vector<8x128xf32> -> vector<8x128xf32>
    %c0_14 = arith.constant 0 : index
    %c0_15 = arith.constant 0 : index
    %30 = vector.load %arg6[%c0_14, %c0_15] : memref<1x128xf32, #tpu.memory_space<vmem>>, vector<1x128xf32>
    %31 = vector.broadcast %30 : vector<1x128xf32> to vector<8x128xf32>
    %32 = arith.addf %29, %31 : vector<8x128xf32>
    %cst_16 = arith.constant dense<0xFF800000> : vector<8xf32>
    %33 = vector.multi_reduction <maximumf>, %32, %cst_16 [1] : vector<8x128xf32> to vector<8xf32>
    %34 = vector.shape_cast %33 : vector<8xf32> to vector<8x1xf32>
    %35 = tpu.iota {dimensions = array<i32: 1>} : vector<8x128xi32>
    %36 = vector.broadcast %34 : vector<8x1xf32> to vector<8x128xf32>
    %37 = arith.cmpf oeq, %32, %36 : vector<8x128xf32>
    %c1073741824_i32 = arith.constant 1073741824 : i32
    %38 = vector.broadcast %c1073741824_i32 : i32 to vector<8x128xi32>
    %39 = arith.select %37, %35, %38 : vector<8x128xi1>, vector<8x128xi32>
    %cst_17 = arith.constant dense<2147483647> : vector<8xi32>
    %40 = vector.multi_reduction <minsi>, %39, %cst_17 [1] : vector<8x128xi32> to vector<8xi32>
    %41 = vector.shape_cast %40 : vector<8xi32> to vector<1x8xi32>
    %c0_18 = arith.constant 0 : index
    %c0_19 = arith.constant 0 : index
    %42 = vector.load %arg7[%c0_18, %c0_19] : memref<1x8xi32, #tpu.memory_space<vmem>>, vector<1x8xi32>
    tpu.vector_store %arg7[%c0_18, %c0_19], %41 {strides = array<i32>} : memref<1x8xi32, #tpu.memory_space<vmem>>, vector<1x8xi32>,
    return
  }
  func.func @transform_0(%arg0: i32) -> (i32, i32, i32) {
    %c0_i32 = arith.constant 0 : i32
    %c0_i32_0 = arith.constant 0 : i32
    %c0_i32_1 = arith.constant 0 : i32
    return %arg0, %c0_i32, %c0_i32_0 : i32, i32, i32
  }
  func.func @transform_1(%arg0: i32) -> (i32, i32) {
    %c0_i32 = arith.constant 0 : i32
    %c0_i32_0 = arith.constant 0 : i32
    %c0_i32_1 = arith.constant 0 : i32
    return %c0_i32, %c0_i32_0 : i32, i32
  }
  func.func @transform_2(%arg0: i32) -> (i32, i32) {
    %c0_i32 = arith.constant 0 : i32
    %c0_i32_0 = arith.constant 0 : i32
    %c0_i32_1 = arith.constant 0 : i32
    return %c0_i32, %c0_i32_0 : i32, i32
  }
  func.func @transform_3(%arg0: i32) -> (i32, i32) {
    %c0_i32 = arith.constant 0 : i32
    %c0_i32_0 = arith.constant 0 : i32
    %c0_i32_1 = arith.constant 0 : i32
    return %c0_i32, %c0_i32_0 : i32, i32
  }
  func.func @transform_4(%arg0: i32) -> (i32, i32) {
    %c0_i32 = arith.constant 0 : i32
    %c0_i32_0 = arith.constant 0 : i32
    %c0_i32_1 = arith.constant 0 : i32
    return %c0_i32, %c0_i32_0 : i32, i32
  }
  func.func @transform_5(%arg0: i32) -> (i32, i32) {
    %c0_i32 = arith.constant 0 : i32
    %c0_i32_0 = arith.constant 0 : i32
    %c0_i32_1 = arith.constant 0 : i32
    return %c0_i32, %c0_i32_0 : i32, i32
  }
  func.func @transform_6(%arg0: i32) -> (i32, i32) {
    %c0_i32 = arith.constant 0 : i32
    %c0_i32_0 = arith.constant 0 : i32
    return %c0_i32, %arg0 : i32, i32
  }
}

</mosaic_0001>

<bundles_post_ra>
// kernel: tpu_custom_call.1
= control target key start
LH: loop header
LB: loop body
LE: loop exit
PB: predicated region body
PF: predicated region fallthrough
CT: control target
= control target key end

     0   :  { %11 = vsyncpa [#allocation3], 0  ;;  %s1627_s0 = inlined_call_operand.hbm [shape: bf16[8,24,32], index: 0, kind: input, shape index: {}]   ;;  %s1628_s1 = inlined_call_operand.hbm [shape: bf16[160,128], index: 1, kind: input, shape index: {}]   ;;  %s1629_s2 = inlined_call_operand.vmem [shape: f32[1,128], index: 2, kind: input, shape index: {}]   ;;  %s1630_s3 = inlined_call_operand.vmem [shape: s32[1,128], index: 3, kind: input, shape index: {}]   ;;  %s1631_s4 = inlined_call_operand.hbm [shape: bf16[128,128], index: 4, kind: input, shape index: {}]   ;;  %s1632_s5 = inlined_call_operand.vmem [shape: f32[1,128], index: 5, kind: input, shape index: {}]   ;;  %s1633_s6 = inlined_call_operand.hbm [shape: s32[1,8], index: 6, kind: output, shape index: {}]  }
   0x1   :  { %12 = vsyncpa [#allocation6], 0 }
   0x2   :  { %13 = vsyncpa [#allocation4], 0  ;;  %s1213_s21 = smov [#allocation5]   ;;  %s1214_s23 = smov [#allocation2]  }
   0x3   :  { %s31_s22 = sshll.u32 %s1213_s21, 4  ;;  %s19_s24 = sshll.u32 %s1214_s23, 4  ;;  %s32_s22 = int_to_ptr.vmem [resolvable:$true] %s31_s22  ;;  %s1259_s24 = int_to_ptr.vmem [resolvable:$true] %s19_s24 }
   0x4   :  { %s1119_s27 = scalar_lea.hbm %s1628_s1, 1280 }
   0x5   :  { %p1120_p0 = scmp.ne.s32.totalorder %s1628_s1, %s1119_s27  ;;  %p1123_p1 = scmp.lt.u32.totalorder %s1119_s27, %s1628_s1 }
   0x7   :  { %p1125_p2 = pnand %p1123_p1, %p1120_p0 }
   0x9   :  { %1128 = shalt.err (!%p1125_p2)
}
   0xa   :  { %s1129_s8 = scalar_lea.vmem %s32_s22, 1280  ;;  %p1134_p4 = scmp.lt.s32.totalorder %s32_s22, %s32_s22 }
   0xb   :  { %p1130_p3 = scmp.ne.s32.totalorder %s32_s22, %s1129_s8  ;;  %p1135_p5 = scmp.lt.s32.totalorder %s1129_s8, %s1129_s8 }
   0xd   :  { %p1136_p6 = por %p1135_p5, %p1134_p4 }
   0xf   :  { %p1137_p7 = pnand %p1136_p6, %p1130_p3 }
  0x11   :  { %1140 = shalt.err (!%p1137_p7)
}
  0x12   :  { %s1215_s9 = smov 64   ;;  %s1216_s10 = smov 4  }
  0x13   :  { %37 = dma.hbm_to_vmem [thread:$0]  %s1628_s1, 1280, %s32_s22, [#allocation6], %s1215_s9, %s1215_s9, %s1216_s10  }
  0x14   :  { %s1141_s15 = scalar_lea.hbm %s1627_s0, 1536 }
  0x15   :  { %p1142_p8 = scmp.ne.s32.totalorder %s1627_s0, %s1141_s15  ;;  %p1145_p9 = scmp.lt.u32.totalorder %s1141_s15, %s1627_s0 }
  0x17   :  { %p1147_p10 = pnand %p1145_p9, %p1142_p8 }
  0x19   :  { %1150 = shalt.err (!%p1147_p10)
}
  0x1a   :  { %s1151_s20 = scalar_lea.vmem %s1259_s24, 1536  ;;  %p1156_p12 = scmp.lt.s32.totalorder %s1259_s24, %s1259_s24 }
  0x1b   :  { %p1152_p11 = scmp.ne.s32.totalorder %s1259_s24, %s1151_s20  ;;  %p1157_p13 = scmp.lt.s32.totalorder %s1151_s20, %s1151_s20 }
  0x1d   :  { %p1158_p0 = por %p1157_p13, %p1156_p12 }
  0x1f   :  { %p1159_p1 = pnand %p1158_p0, %p1152_p11 }
  0x21   :  { %1162 = shalt.err (!%p1159_p1)
}
  0x22   :  { %25 = dma.hbm_to_vmem [thread:$0]  %s1627_s0, 1536, %s1259_s24, [#allocation3], %s1215_s9, %s1215_s9, %s1216_s10  }
  0x23   :  { %s1217_s22 = smov [#allocation7]   ;;  %s1163_s27 = scalar_lea.hbm %s1631_s4, 1024 }
  0x24   :  { %s47_s23 = sshll.u32 %s1217_s22, 4  ;;  %p1164_p2 = scmp.ne.s32.totalorder %s1631_s4, %s1163_s27  ;;  %s48_s23 = int_to_ptr.vmem [resolvable:$true] %s47_s23 }
  0x25   :  { %p1167_p3 = scmp.lt.u32.totalorder %s1163_s27, %s1631_s4 }
  0x27   :  { %p1169_p4 = pnand %p1167_p3, %p1164_p2 }
  0x29   :  { %1172 = shalt.err (!%p1169_p4)
}
  0x2a   :  { %s1173_s8 = scalar_lea.vmem %s48_s23, 1024  ;;  %p1178_p6 = scmp.lt.s32.totalorder %s48_s23, %s48_s23 }
  0x2b   :  { %p1174_p5 = scmp.ne.s32.totalorder %s48_s23, %s1173_s8  ;;  %p1179_p7 = scmp.lt.s32.totalorder %s1173_s8, %s1173_s8 }
  0x2d   :  { %p1180_p8 = por %p1179_p7, %p1178_p6 }
  0x2f   :  { %p1181_p9 = pnand %p1180_p8, %p1174_p5 }
  0x31   :  { %1184 = shalt.err (!%p1181_p9)
}
  0x32   :  { %53 = dma.hbm_to_vmem [thread:$0]  %s1631_s4, 1024, %s48_s23, [#allocation6], %s1215_s9, %s1215_s9, %s1216_s10  }
  0x33   :  { %1207 = dma.done.wait [#allocation3], 1536  }
  0x34   :  { %1208 = vsyncadd [#allocation3], 4294965760 }
  0x35   :  { %1209 = dma.done.wait [#allocation6], 2304  }
  0x36   :  { %1210 = vsyncadd [#allocation6], 4294964992  ;;  %v1218_v0 = vmov 0   ;;  %vm154_vm0 = vsmask.f32 7424  ;;  %v1312_v1 = vld [vmem:[#allocation2] sm:$0xff]  }
  0x37   :  { %585 = vmatprep.subr.bf16.mxu0 %v1218_v0  ;;  %vm308_vm1 = vsmask.f32 6400  ;;  %v1314_v2 = vld [vmem:[#allocation2 + $0x8] ss:$0 sps:$4 sm:$0xff]   ;;  %vm267_vm2 = vcmask 1046528   ;;  %v1316_v3 = vld [vmem:[#allocation2 + $0xc] sm:$0xff]  }
  0x38   :  { %v156_v4 = vshrl.u32 %v1312_v1, 16  ;;  %v158_v5 = vshll.u32 %v1312_v1, 16  ;;  %v163_v6 = vshll.u32 %v1314_v2, 16  ;;  %v312_v7 = vshrl.u32 %v1314_v2, 16  ;;  %v1322_v8 = vld [vmem:[#allocation2 + $0x14] ss:$0 sps:$4 sm:$0xff]  }
  0x39   :  { %v268_v9 = vrot.slane %v1312_v1, 1  ;;  %v269_v10 = vrot.slane %v1314_v2, 1  ;;  %v168_v11 = vshrl.u32 %v1316_v3, 16  ;;  %v170_v12 = vshll.u32 %v1316_v3, 16  ;;  %v1328_v20 = vld [vmem:[#allocation2 + $0x18] sm:$0xff]   ;;  %s1219_s4 = smov 32  }
  0x3a   :  { %v160_v13 = vrot.slane %v158_v5, 1  ;;  %v165_v14 = vrot.slane %v163_v6, 1  ;;  %v309_v15 = vrot.slane %v156_v4, 1  ;;  %v310_v16 = vrot.slane %v158_v5, 2  ;;  %v1332_v25 = vld [vmem:[#allocation2 + $0x20] ss:$0 sps:$4 sm:$0xff]  }
  0x3b   :  { %v314_v17 = vrot.slane %v312_v7, 1  ;;  %v315_v18 = vrot.slane %v163_v6, 2  ;;  %v172_v19 = vrot.slane %v170_v12, 1  ;;  %v175_v23 = vshll.u32 %v1322_v8, 16  ;;  %s1220_s10 = smov 96   ;;  %v1345_v44 = vld [vmem:[#allocation2 + $0x24] sm:$0xff]  }
  0x3c   :  { %v161_v21 = vor.u32 %v160_v13, %v156_v4  ;;  %v311_v22 = vor.u32 %v310_v16, %v309_v15  ;;  %v271_v24 = vrot.slane %v1316_v3, 1  ;;  %v272_v28 = vrot.slane %v1322_v8, 1  ;;  %v1347_v45 = vld [vmem:[#allocation2 + $0x2c] ss:$0 sps:$4 sm:$0xff]   ;;  %v1101_v57 = vld [vmem:[#allocation5] sm:$0xff]   ;;  %v1359_v62 = vld [vmem:[#allocation2 + $0x30] sm:$0xff]  }
  0x3d   :  { %v316_v26 = vor.u32 %v315_v18, %v314_v17  ;;  %v173_v27 = vor.u32 %v172_v19, %v168_v11  ;;  %v318_v29 = vrot.slane %v168_v11, 1  ;;  %v177_v31 = vrot.slane %v175_v23, 1  ;;  %586 = vmatpush1.bf16.msra.mxu0 %v1101_v57  ;;  %v1366_v11 = vld [vmem:[#allocation2 + $0x3c] sm:$0xff]  }
  0x3e   :  { %v166_v30 = vsel %vm154_vm0, %v161_v21, %v165_v14  ;;  %v319_v32 = vrot.slane %v170_v12, 2  ;;  %v321_v33 = vshrl.u32 %v1322_v8, 16  ;;  %v324_v35 = vrot.slane %v175_v23, 2  ;;  %587 = vmatprep.subr.bf16.mxu0 %v1218_v0  ;;  %v1102_v12 = vld [vmem:[#allocation5 + $0x8] sm:$0xff]  }
  0x3f   :  { %251 = vrot.lane.b32.xlu0 %v166_v30, %s1219_s4  ;;  %v317_v34 = vsel %vm308_vm1, %v311_v22, %v316_v26  ;;  %v180_v36 = vshrl.u32 %v1328_v20, 16  ;;  %v270_v37 = vsel %vm267_vm2, %v268_v9, %v269_v10  ;;  %v182_v39 = vshll.u32 %v1328_v20, 16  ;;  %v1364_v10 = vld [vmem:[#allocation2 + $0x38] ss:$0 sps:$4 sm:$0xff]   ;;  %v1103_v26 = vld [vmem:[#allocation5 + $0x10] sm:$0xff]  }
  0x40   :  { %381 = vrot.lane.b32.xlu1 %v317_v34, %s1220_s10  ;;  %v323_v38 = vrot.slane %v321_v33, 1  ;;  %v178_v40 = vsel %vm154_vm0, %v173_v27, %v177_v31  ;;  %v320_v41 = vor.u32 %v319_v32, %v318_v29  ;;  %v187_v42 = vshll.u32 %v1332_v25, 16 }
  0x41   :  { %v327_v43 = vrot.slane %v180_v36, 1  ;;  %v184_v47 = vrot.slane %v182_v39, 1  ;;  %v328_v48 = vrot.slane %v182_v39, 2  ;;  %v330_v49 = vshrl.u32 %v1332_v25, 16  ;;  %588 = vmatpush1.bf16.msra.mxu0 %v1102_v12 }
  0x42   :  { %v325_v46 = vor.u32 %v324_v35, %v323_v38  ;;  %v273_v50 = vsel %vm267_vm2, %v271_v24, %v272_v28  ;;  %v189_v51 = vrot.slane %v187_v42, 1  ;;  %v333_v52 = vrot.slane %v187_v42, 2  ;;  %v1375_v24 = vld [vmem:[#allocation2 + $0x44] ss:$0 sps:$4 sm:$0xff]   ;;  %589 = vmatprep.subr.bf16.mxu0 %v1218_v0  ;;  %v1384_v35 = vld [vmem:[#allocation2 + $0x48] sm:$0xff]  }
  0x43   :  { %292 = vrot.lane.b32.xlu0 %v270_v37, %s1215_s9  ;;  %v185_v53 = vor.u32 %v184_v47, %v180_v36  ;;  %v274_v54 = vrot.slane %v1328_v20, 1  ;;  %v275_v55 = vrot.slane %v1332_v25, 1  ;;  %v332_v56 = vrot.slane %v330_v49, 1 }
  0x44   :  { %253 = vrot.lane.b32.xlu1 %v178_v40, %s1219_s4  ;;  %v326_v58 = vsel %vm308_vm1, %v320_v41, %v325_v46  ;;  %v192_v59 = vshrl.u32 %v1345_v44, 16  ;;  %v194_v60 = vshll.u32 %v1345_v44, 16  ;;  %v199_v61 = vshll.u32 %v1347_v45, 16  ;;  %v1389_v40 = vld [vmem:[#allocation2 + $0x50] ss:$0 sps:$4 sm:$0xff]   ;;  %v1104_v46 = vld [vmem:[#allocation5 + $0x18] sm:$0xff]  }
  0x45   :  { %v329_v63 = vor.u32 %v328_v48, %v327_v43  ;;  %v339_v4 = vshrl.u32 %v1347_v45, 16  ;;  %v190_v5 = vsel %vm154_vm0, %v185_v53, %v189_v51  ;;  %v334_v6 = vor.u32 %v333_v52, %v332_v56  ;;  %590 = vmatpush1.bf16.msra.mxu0 %v1103_v26 }
  0x46   :  { %v196_v7 = vrot.slane %v194_v60, 1  ;;  %v336_v9 = vrot.slane %v192_v59, 1  ;;  %v201_v13 = vrot.slane %v199_v61, 1  ;;  %v337_v14 = vrot.slane %v194_v60, 2  ;;  %591 = vmatprep.subr.bf16.mxu0 %v1218_v0 }
  0x47   :  { %294 = vrot.lane.b32.xlu0 %v273_v50, %s1215_s9  ;;  %v341_v15 = vrot.slane %v339_v4, 1  ;;  %v342_v16 = vrot.slane %v199_v61, 2  ;;  %v276_v17 = vsel %vm267_vm2, %v274_v54, %v275_v55  ;;  %v204_v19 = vshrl.u32 %v1359_v62, 16  ;;  %v1398_v55 = vld [vmem:[#allocation2 + $0x54] sm:$0xff]   ;;  %v1105_v4 = vld [vmem:[#allocation5 + $0x20] sm:$0xff]  }
  0x48   :  { %383 = vrot.lane.b32.xlu1 %v326_v58, %s1220_s10  ;;  %v197_v18 = vor.u32 %v196_v7, %v192_v59  ;;  %v206_v21 = vshll.u32 %v1359_v62, 16  ;;  %v277_v22 = vrot.slane %v1345_v44, 1  ;;  %v278_v23 = vrot.slane %v1347_v45, 1  ;;  %v1401_v58 = vld [vmem:[#allocation2 + $0x5c] ss:$0 sps:$4 sm:$0xff]  }
  0x49   :  { %v211_v28 = vshll.u32 %v1364_v10, 16  ;;  %v280_v29 = vrot.slane %v1359_v62, 1  ;;  %v345_v30 = vrot.slane %v204_v19, 1  ;;  %v335_v31 = vsel %vm308_vm1, %v329_v63, %v334_v6  ;;  %592 = vmatpush1.bf16.msra.mxu0 %v1104_v46 }
  0x4a   :  { %v208_v27 = vrot.slane %v206_v21, 1  ;;  %v338_v32 = vor.u32 %v337_v14, %v336_v9  ;;  %v346_v33 = vrot.slane %v206_v21, 2  ;;  %v348_v34 = vshrl.u32 %v1364_v10, 16  ;;  %593 = vmatprep.subr.bf16.mxu0 %v1218_v0 }
  0x4b   :  { %255 = vrot.lane.b32.xlu0 %v190_v5, %s1219_s4  ;;  %v202_v36 = vsel %vm154_vm0, %v197_v18, %v201_v13  ;;  %v343_v37 = vor.u32 %v342_v16, %v341_v15  ;;  %v216_v38 = vshrl.u32 %v1366_v11, 16  ;;  %v218_v39 = vshll.u32 %v1366_v11, 16  ;;  %v1106_v16 = vld [vmem:[#allocation5 + $0x28] sm:$0xff]  }
  0x4c   :  { %296 = vrot.lane.b32.xlu1 %v276_v17, %s1215_s9  ;;  %v281_v41 = vrot.slane %v1364_v10, 1  ;;  %v350_v42 = vrot.slane %v348_v34, 1  ;;  %v351_v43 = vrot.slane %v211_v28, 2  ;;  %v213_v47 = vrot.slane %v211_v28, 1 }
  0x4d   :  { %v220_v48 = vrot.slane %v218_v39, 1  ;;  %v223_v49 = vshll.u32 %v1375_v24, 16  ;;  %v354_v50 = vrot.slane %v216_v38, 1  ;;  %v279_v51 = vsel %vm267_vm2, %v277_v22, %v278_v23  ;;  %594 = vmatpush1.bf16.msra.mxu0 %v1105_v4 }
  0x4e   :  { %v209_v52 = vor.u32 %v208_v27, %v204_v19  ;;  %v355_v53 = vrot.slane %v218_v39, 2  ;;  %v357_v54 = vshrl.u32 %v1375_v24, 16  ;;  %v344_v56 = vsel %vm308_vm1, %v338_v32, %v343_v37  ;;  %595 = vmatprep.subr.bf16.mxu0 %v1218_v0  ;;  %v1107_v37 = vld [vmem:[#allocation5 + $0x30] sm:$0xff]  }
  0x4f   :  { %385 = vrot.lane.b32.xlu0 %v335_v31, %s1220_s10  ;;  %v347_v57 = vor.u32 %v346_v33, %v345_v30  ;;  %v352_v59 = vor.u32 %v351_v43, %v350_v42  ;;  %v360_v61 = vrot.slane %v223_v49, 2  ;;  %v230_v63 = vshll.u32 %v1384_v35, 16 }
  0x50   :  { %257 = vrot.lane.b32.xlu1 %v202_v36, %s1219_s4  ;;  %v359_v60 = vrot.slane %v357_v54, 1  ;;  %vm397_vm3 = vcmask 1045504   ;;  %v282_v5 = vsel %vm267_vm2, %v280_v29, %v281_v41  ;;  %v283_v6 = vrot.slane %v1366_v11, 1  ;;  %v1108_v54 = vld [vmem:[#allocation5 + $0x38] sm:$0xff]  }
  0x51   :  { %v284_v7 = vrot.slane %v1375_v24, 1  ;;  %v235_v9 = vshll.u32 %v1389_v40, 16  ;;  %v214_v12 = vsel %vm154_vm0, %v209_v52, %v213_v47  ;;  %v221_v13 = vor.u32 %v220_v48, %v216_v38  ;;  %596 = vmatpush1.bf16.msra.mxu0 %v1106_v16 }
  0x52   :  { %v225_v14 = vrot.slane %v223_v49, 1  ;;  %v356_v15 = vor.u32 %v355_v53, %v354_v50  ;;  %v228_v17 = vshrl.u32 %v1384_v35, 16  ;;  %v286_v18 = vrot.slane %v1384_v35, 1  ;;  %597 = vmatprep.subr.bf16.mxu0 %v1218_v0 }
  0x53   :  { %298 = vrot.lane.b32.xlu0 %v279_v51, %s1215_s9  ;;  %v287_v19 = vrot.slane %v1389_v40, 1  ;;  %v366_v21 = vshrl.u32 %v1389_v40, 16  ;;  %vm422_vm4 = vcmask 261120   ;;  %v353_v22 = vsel %vm308_vm1, %v347_v57, %v352_v59 }
  0x54   :  { %387 = vrot.lane.b32.xlu1 %v344_v56, %s1220_s10  ;;  %v361_v23 = vor.u32 %v360_v61, %v359_v60  ;;  %v232_v26 = vrot.slane %v230_v63, 1  ;;  %v242_v27 = vshll.u32 %v1398_v55, 16  ;;  %v237_v28 = vrot.slane %v235_v9, 1 }
  0x55   :  { %v1419_v29 = vrot.slane %v228_v17, 1  ;;  %v240_v30 = vshrl.u32 %v1398_v55, 16  ;;  %v247_v31 = vshll.u32 %v1401_v58, 16  ;;  %v364_v32 = vrot.slane %v230_v63, 2  ;;  %598 = vmatpush1.bf16.msra.mxu0 %v1107_v37 }
  0x56   :  { %v368_v33 = vrot.slane %v366_v21, 1  ;;  %v369_v34 = vrot.slane %v235_v9, 2  ;;  %v244_v36 = vrot.slane %v242_v27, 1  ;;  %v226_v38 = vsel %vm154_vm0, %v221_v13, %v225_v14  ;;  %599 = vmatprep.subr.bf16.mxu0 %v1218_v0 }
  0x57   :  { %259 = vrot.lane.b32.xlu0 %v214_v12, %s1219_s4  ;;  %v285_v39 = vsel %vm267_vm2, %v283_v6, %v284_v7  ;;  %v1427_v41 = vrot.slane %v240_v30, 1  ;;  %v375_v42 = vshrl.u32 %v1401_v58, 16  ;;  %v362_v43 = vsel %vm308_vm1, %v356_v15, %v361_v23 }
  0x58   :  { %300 = vrot.lane.b32.xlu1 %v282_v5, %s1215_s9  ;;  %v233_v46 = vor.u32 %v232_v26, %v228_v17  ;;  %v373_v47 = vrot.slane %v242_v27, 2  ;;  %v398_v48 = vrot.slane %v1312_v1, 2  ;;  %v249_v49 = vrot.slane %v247_v31, 1  ;;  %v1110_v27 = vld [vmem:[#allocation5 + $0x48] sm:$0xff]  }
  0x59   :  { %v378_v50 = vrot.slane %v247_v31, 2  ;;  %v399_v51 = vrot.slane %v1314_v2, 2  ;;  %v401_v52 = vrot.slane %v1316_v3, 2  ;;  %v377_v53 = vrot.slane %v375_v42, 1  ;;  %600 = vmatpush1.bf16.msra.mxu0 %v1108_v54 }
  0x5a   :  { %v402_v56 = vrot.slane %v1322_v8, 2  ;;  %v404_v57 = vrot.slane %v1328_v20, 2  ;;  %v405_v59 = vrot.slane %v1332_v25, 2  ;;  %v365_v60 = vor.u32 %v364_v32, %v1419_v29  ;;  %601 = vmatprep.subr.bf16.mxu0 %v1218_v0 }
  0x5b   :  { %389 = vrot.lane.b32.xlu0 %v353_v22, %s1220_s10  ;;  %v400_v61 = vsel %vm397_vm3, %v398_v48, %v399_v51  ;;  %v407_v63 = vrot.slane %v1345_v44, 2  ;;  %v408_v2 = vrot.slane %v1347_v45, 2  ;;  %v410_v8 = vrot.slane %v1359_v62, 2 }
  0x5c   :  { %261 = vrot.lane.b32.xlu1 %v226_v38, %s1219_s4  ;;  %1026 = vmatprep.mubr.msk.bf16.mxu0 %vm422_vm4, %v400_v61  ;;  %v403_v4 = vsel %vm397_vm3, %v401_v52, %v402_v56  ;;  %v1447_v5 = vsel %vm397_vm3, %v404_v57, %v405_v59  ;;  %v411_v25 = vrot.slane %v1364_v10, 2  ;;  %v238_v6 = vsel %vm154_vm0, %v233_v46, %v237_v28 }
  0x5d   :  { %v1455_v45 = vsel %vm397_vm3, %v407_v63, %v408_v2  ;;  %v413_v7 = vrot.slane %v1366_v11, 2  ;;  %v414_v9 = vrot.slane %v1375_v24, 2  ;;  %v370_v12 = vor.u32 %v369_v34, %v368_v33  ;;  %v1109_v24 = vld [vmem:[#allocation5 + $0x40] sm:$0xff]  }
  0x5e   :  { %v1461_v13 = vsel %vm397_vm3, %v410_v8, %v411_v25  ;;  %v416_v10 = vrot.slane %v1384_v35, 2  ;;  %v417_v14 = vrot.slane %v1389_v40, 2  ;;  %v288_v15 = vsel %vm267_vm2, %v286_v18, %v287_v19  ;;  %602 = vmatpush1.bf16.msra.mxu0 %v1109_v24 }
  0x5f   :  { %302 = vrot.lane.b32.xlu0 %v285_v39, %s1215_s9  ;;  %v245_v16 = vor.u32 %v244_v36, %v240_v30  ;;  %v1471_v17 = vsel %vm397_vm3, %v413_v7, %v414_v9  ;;  %v371_v40 = vsel %vm308_vm1, %v365_v60, %v370_v12  ;;  %v289_v22 = vrot.slane %v1398_v55, 1  ;;  %603 = vmatprep.subr.bf16.mxu0 %v1218_v0 }
  0x60   :  { %391 = vrot.lane.b32.xlu1 %v362_v43, %s1220_s10  ;;  %v1474_v21 = vsel %vm397_vm3, %v416_v10, %v417_v14  ;;  %v290_v18 = vrot.slane %v1401_v58, 1  ;;  %v374_v23 = vor.u32 %v373_v47, %v1427_v41  ;;  %v379_v26 = vor.u32 %v378_v50, %v377_v53 }
  0x61   :  { %v250_v19 = vsel %vm154_vm0, %v245_v16, %v249_v49  ;;  %v419_v29 = vrot.slane %v1398_v55, 2  ;;  %v420_v30 = vrot.slane %v1401_v58, 2  ;;  %vm439_vm5 = vcmask 523264  }
  0x62   :  { %v291_v28 = vsel %vm267_vm2, %v289_v22, %v290_v18  ;;  %v380_v31 = vsel %vm308_vm1, %v374_v23, %v379_v26  ;;  %604 = vmatpush1.bf16.msra.mxu0 %v1110_v27  ;;  %vm456_vm6 = vcmask 785408   ;;  %v1221_v24 = vmov 0.0   ;;  %v1115_v22 = vld [vmem:[#allocation7 + $0x20] sm:$0xff]   ;;  %v1116_v18 = vld [vmem:[#allocation7 + $0x28] sm:$0xff]   ;;  %v1118_v23 = vld [vmem:[#allocation7 + $0x38] sm:$0xff]  }
  0x63   :  { %263 = vrot.lane.b32.xlu0 %v238_v6, %s1219_s4  ;;  %v1492_v32 = vsel %vm397_vm3, %v419_v29, %v420_v30  ;;  %1054 = vmatprep.subr.bf16.mxu1 %v1221_v24  ;;  %vm1222_vm7 = vmmov 0   ;;  %v721_v26 = vlaneseq  ;;  %vm854_vm10 = vcmask 1041409  }
  0x64   :  { %304 = vrot.lane.b32.xlu1 %v288_v15, %s1215_s9  ;;  %1070 = vmatprep.mubr.msk.bf16.mxu1 %vm1222_vm7, %v1221_v24  ;;  %vm856_vm11 = vcmask 1042434   ;;  %vm858_vm12 = vcmask 1043459   ;;  %vm860_vm13 = vcmask 1044484   ;;  %vm862_vm14 = vcmask 1045509  }
  0x65   :  { %v1542_v27 = vshrl.u32 %v721_v26, 7  ;;  %vm864_vm15 = vcmask 1046534   ;;  %vm866_vm0 = vcmask 1047559   ;;  %vm982_vm3 = vcmask 57344  }
  0x67   :  { %393 = vrot.lane.b32.xlu0 %v371_v40, %s1220_s10  ;;  %v1113_v40 = vld [vmem:[#allocation7 + $0x10] sm:$0xff]   ;;  %v723_v30 = vadd.s32 8, %v1542_v27 }
  0x68   :  { %265 = vrot.lane.b32.xlu1 %v250_v19, %s1219_s4  ;;  %v1117_v19 = vld [vmem:[#allocation7 + $0x30] sm:$0xff]  }
  0x6b   :  { %306 = vrot.lane.b32.xlu0 %v291_v28, %s1215_s9  ;;  %v1547_v28 = vld [vmem:[%s1629_s2] ss:$0 sm:$0xff] }
  0x6c   :  { %395 = vrot.lane.b32.xlu1 %v380_v31, %s1220_s10 }
  0xb1   :  { %v252_v33 = vpop.permute.xlu0 %251 }
  0xb2   :  { %v382_v0 = vpop.permute.xlu1 %381  ;;  %v424_v34 = vsel %vm422_vm4, %v1312_v1, %v252_v33 }
  0xb5   :  { %v293_v36 = vpop.permute.xlu0 %292 }
  0xb6   :  { %v441_v58 = vsel %vm439_vm5, %v424_v34, %v293_v36  ;;  %v254_v37 = vpop.permute.xlu1 %253 }
  0xb7   :  { %v458_v38 = vsel %vm456_vm6, %v441_v58, %v382_v0  ;;  %v426_v39 = vsel %vm422_vm4, %v1316_v3, %v254_v37 }
  0xb8   :  { %618 = vmatmul.mubr.bf16.vlgmr.msra.gmra.mrb[0].mxu0 %v458_v38 }
  0xb9   :  { %v295_v41 = vpop.permute.xlu0 %294  ;;  %1027 = vmatprep.mubr.msk.bf16.mxu0 %vm422_vm4, %v403_v4 }
  0xba   :  { %v443_v42 = vsel %vm439_vm5, %v426_v39, %v295_v41  ;;  %v384_v43 = vpop.permute.xlu1 %383 }
  0xbb   :  { %v461_v47 = vsel %vm456_vm6, %v443_v42, %v384_v43 }
  0xbd   :  { %v256_v46 = vpop.permute.xlu0 %255 }
  0xbe   :  { %v297_v1 = vpop.permute.xlu1 %296  ;;  %v428_v48 = vsel %vm422_vm4, %v1328_v20, %v256_v46 }
  0xbf   :  { %v445_v49 = vsel %vm439_vm5, %v428_v48, %v297_v1 }
  0xc0   :  { %626 = vmatmul.mubr.bf16.gmra.mrb[4].mxu0 %v461_v47 }
  0xc1   :  { %1028 = vmatprep.mubr.msk.bf16.mxu0 %vm422_vm4, %v1447_v5  ;;  %v386_v3 = vpop.permute.xlu0 %385 }
  0xc2   :  { %v258_v50 = vpop.permute.xlu1 %257  ;;  %v464_v51 = vsel %vm456_vm6, %v445_v49, %v386_v3 }
  0xc3   :  { %v430_v53 = vsel %vm422_vm4, %v1345_v44, %v258_v50 }
  0xc5   :  { %v299_v52 = vpop.permute.xlu0 %298 }
  0xc6   :  { %v447_v54 = vsel %vm439_vm5, %v430_v53, %v299_v52  ;;  %v388_v20 = vpop.permute.xlu1 %387 }
  0xc7   :  { %v467_v57 = vsel %vm456_vm6, %v447_v54, %v388_v20 }
  0xc8   :  { %634 = vmatmul.mubr.bf16.gmra.mrb[8].mxu0 %v464_v51 }
  0xc9   :  { %1029 = vmatprep.mubr.msk.bf16.mxu0 %vm422_vm4, %v1455_v45  ;;  %v260_v56 = vpop.permute.xlu0 %259 }
  0xca   :  { %v301_v59 = vpop.permute.xlu1 %300  ;;  %v432_v60 = vsel %vm422_vm4, %v1359_v62, %v260_v56 }
  0xcb   :  { %v449_v61 = vsel %vm439_vm5, %v432_v60, %v301_v59 }
  0xcd   :  { %v390_v44 = vpop.permute.xlu0 %389 }
  0xce   :  { %v262_v63 = vpop.permute.xlu1 %261  ;;  %v470_v2 = vsel %vm456_vm6, %v449_v61, %v390_v44 }
  0xcf   :  { %v434_v5 = vsel %vm422_vm4, %v1366_v11, %v262_v63 }
  0xd0   :  { %642 = vmatmul.mubr.bf16.gmra.mrb[12].mxu0 %v467_v57 }
  0xd1   :  { %1030 = vmatprep.mubr.msk.bf16.mxu0 %vm422_vm4, %v1461_v13  ;;  %v303_v4 = vpop.permute.xlu0 %302 }
  0xd2   :  { %v451_v8 = vsel %vm439_vm5, %v434_v5, %v303_v4  ;;  %v392_v62 = vpop.permute.xlu1 %391 }
  0xd3   :  { %v473_v6 = vsel %vm456_vm6, %v451_v8, %v392_v62 }
  0xd5   :  { %v264_v25 = vpop.permute.xlu0 %263 }
  0xd6   :  { %v305_v45 = vpop.permute.xlu1 %304  ;;  %v436_v7 = vsel %vm422_vm4, %v1384_v35, %v264_v25 }
  0xd7   :  { %v453_v9 = vsel %vm439_vm5, %v436_v7, %v305_v45 }
  0xd8   :  { %650 = vmatmul.mubr.bf16.gmra.mrb[16].mxu0 %v470_v2 }
  0xd9   :  { %1031 = vmatprep.mubr.msk.bf16.mxu0 %vm422_vm4, %v1471_v17  ;;  %v394_v11 = vpop.permute.xlu0 %393  ;;  %v1111_v17 = vld [vmem:[#allocation7] sm:$0xff]  }
  0xda   :  { %v266_v12 = vpop.permute.xlu1 %265  ;;  %v476_v13 = vsel %vm456_vm6, %v453_v9, %v394_v11  ;;  %1055 = vmatpush3.bf16.msra.mxu1 %v1111_v17 }
  0xdb   :  { %v438_v10 = vsel %vm422_vm4, %v1398_v55, %v266_v12  ;;  %1056 = vmatprep.subr.bf16.mxu1 %v1221_v24  ;;  %v1114_v55 = vld [vmem:[#allocation7 + $0x18] sm:$0xff]  }
  0xdd   :  { %v307_v14 = vpop.permute.xlu0 %306 }
  0xde   :  { %v455_v15 = vsel %vm439_vm5, %v438_v10, %v307_v14  ;;  %v396_v35 = vpop.permute.xlu1 %395 }
  0xdf   :  { %v479_v16 = vsel %vm456_vm6, %v455_v15, %v396_v35 }
  0xe0   :  { %658 = vmatmul.mubr.bf16.gmra.mrb[20].mxu0 %v473_v6 }
  0xe1   :  { %1032 = vmatprep.mubr.msk.bf16.mxu0 %vm422_vm4, %v1474_v21  ;;  %v1112_v21 = vld [vmem:[#allocation7 + $0x8] sm:$0xff]  }
  0xe2   :  { %1057 = vmatpush3.bf16.msra.mxu1 %v1112_v21 }
  0xe3   :  { %1058 = vmatprep.subr.bf16.mxu1 %v1221_v24 }
  0xe6   :  { %1059 = vmatpush3.bf16.msra.mxu1 %v1113_v40 }
  0xe7   :  { %1060 = vmatprep.subr.bf16.mxu1 %v1221_v24 }
  0xe8   :  { %666 = vmatmul.mubr.bf16.gmra.mrb[24].mxu0 %v476_v13 }
  0xe9   :  { %1033 = vmatprep.mubr.msk.bf16.mxu0 %vm422_vm4, %v1492_v32  ;;  %v1035_v32 = vld [vmem:[%s1630_s3] ss:$0 sm:$0xff] }
  0xea   :  { %1061 = vmatpush3.bf16.msra.mxu1 %v1114_v55  ;;  %vm1556_vm8 = vcmp.lt.s32.totalorder %v1542_v27, %v1035_v32  ;;  %vm1560_vm9 = vcmp.lt.s32.totalorder %v723_v30, %v1035_v32 }
  0xeb   :  { %1062 = vmatprep.subr.bf16.mxu1 %v1221_v24 }
  0xee   :  { %1063 = vmatpush3.bf16.msra.mxu1 %v1115_v22 }
  0xef   :  { %1064 = vmatprep.subr.bf16.mxu1 %v1221_v24 }
  0xf0   :  { %674 = vmatmul.mubr.bf16.gmra.mrb[28].mxu0 %v479_v16 }
  0xf2   :  { %1065 = vmatpush3.bf16.msra.mxu1 %v1116_v18 }
  0xf3   :  { %1066 = vmatprep.subr.bf16.mxu1 %v1221_v24 }
  0xf6   :  { %1067 = vmatpush3.bf16.msra.mxu1 %v1117_v19 }
  0xf7   :  { %1068 = vmatprep.subr.bf16.mxu1 %v1221_v24 }
  0xfa   :  { %1069 = vmatpush3.bf16.msra.mxu1 %v1118_v23 }
 0x18b   :  { %v619_v29 = vpop.f32.mrb[0].mxu0 }
 0x18c   :  { %v689_v31 = vadd.f32 %v1547_v28, %v619_v29  ;;  %v621_v33 = vpop.f32.mrb[1].mxu0 }
 0x18d   :  { %v622_v0 = vpop.f32.mrb[2].mxu0 }
 0x18e   :  { %v705_v34 = vmax.f32 %v689_v31, 0.0  ;;  %v690_v36 = vadd.f32 %v1547_v28, %v622_v0  ;;  %v624_v58 = vpop.f32.mrb[3].mxu0 }
 0x190   :  { %v706_v39 = vmax.f32 %v690_v36, 0.0  ;;  %v735_v41 = vsel %vm1556_vm8, %v705_v34, 0.0 }
 0x192   :  { %v736_v42 = vsel %vm1560_vm9, %v706_v39, 0.0 }
 0x193   :  { %v751_v43 = vmax.f32 %v735_v41, %v736_v42  ;;  %v627_v46 = vpop.f32.mrb[4].mxu0 }
 0x194   :  { %v691_v47 = vadd.f32 %v1547_v28, %v627_v46  ;;  %v629_v1 = vpop.f32.mrb[5].mxu0 }
 0x195   :  { %v752_v48 = vrot.slane %v751_v43, 4  ;;  %v630_v49 = vpop.f32.mrb[6].mxu0 }
 0x196   :  { %v707_v3 = vmax.f32 %v691_v47, 0.0  ;;  %v692_v50 = vadd.f32 %v1547_v28, %v630_v49  ;;  %v632_v51 = vpop.f32.mrb[7].mxu0 }
 0x197   :  { %v753_v52 = vmax.f32 %v751_v43, %v752_v48 }
 0x198   :  { %v708_v53 = vmax.f32 %v692_v50, 0.0  ;;  %v737_v20 = vsel %vm1556_vm8, %v707_v3, 0.0 }
 0x199   :  { %v754_v54 = vrot.slane %v753_v52, 2 }
 0x19a   :  { %v738_v56 = vsel %vm1560_vm9, %v708_v53, 0.0 }
 0x19b   :  { %v755_v57 = vmax.f32 %v753_v52, %v754_v54  ;;  %v758_v59 = vmax.f32 %v737_v20, %v738_v56  ;;  %v635_v60 = vpop.f32.mrb[8].mxu0 }
 0x19c   :  { %v693_v61 = vadd.f32 %v1547_v28, %v635_v60  ;;  %v637_v44 = vpop.f32.mrb[9].mxu0 }
 0x19d   :  { %v759_v63 = vrot.slane %v758_v59, 4  ;;  %v638_v2 = vpop.f32.mrb[10].mxu0  ;;  %v756_v62 = vrot.slane %v755_v57, 1 }
 0x19e   :  { %v709_v4 = vmax.f32 %v693_v61, 0.0  ;;  %v694_v5 = vadd.f32 %v1547_v28, %v638_v2  ;;  %v640_v8 = vpop.f32.mrb[11].mxu0 }
 0x19f   :  { %v760_v25 = vmax.f32 %v758_v59, %v759_v63  ;;  %v757_v11 = vmax.f32 %v755_v57, %v756_v62 }
 0x1a0   :  { %v710_v6 = vmax.f32 %v694_v5, 0.0  ;;  %v739_v7 = vsel %vm1556_vm8, %v709_v4, 0.0 }
 0x1a1   :  { %v761_v45 = vrot.slane %v760_v25, 2  ;;  %v807_v55 = vpack.c.bf16 %v757_v11, %v757_v11 }
 0x1a2   :  { %v740_v9 = vsel %vm1560_vm9, %v710_v6, 0.0 }
 0x1a3   :  { %v762_v12 = vmax.f32 %v760_v25, %v761_v45  ;;  %v765_v13 = vmax.f32 %v739_v7, %v740_v9  ;;  %v643_v10 = vpop.f32.mrb[12].mxu0  ;;  %v846_v32 = vunpack.c.l.b16 %v807_v55 }
 0x1a4   :  { %v695_v14 = vadd.f32 %v1547_v28, %v643_v10  ;;  %v645_v15 = vpop.f32.mrb[13].mxu0 }
 0x1a5   :  { %v763_v35 = vrot.slane %v762_v12, 1  ;;  %v766_v16 = vrot.slane %v765_v13, 4  ;;  %v646_v17 = vpop.f32.mrb[14].mxu0 }
 0x1a6   :  { %v711_v24 = vmax.f32 %v695_v14, 0.0  ;;  %v696_v21 = vadd.f32 %v1547_v28, %v646_v17  ;;  %v648_v40 = vpop.f32.mrb[15].mxu0 }
 0x1a7   :  { %v764_v22 = vmax.f32 %v762_v12, %v763_v35  ;;  %v767_v18 = vmax.f32 %v765_v13, %v766_v16 }
 0x1a8   :  { %v712_v19 = vmax.f32 %v696_v21, 0.0  ;;  %v741_v30 = vsel %vm1556_vm8, %v711_v24, 0.0 }
 0x1a9   :  { %v808_v23 = vpack.c.bf16 %v764_v22, %v764_v22  ;;  %v768_v29 = vrot.slane %v767_v18, 2 }
 0x1aa   :  { %v742_v31 = vsel %vm1560_vm9, %v712_v19, 0.0 }
 0x1ab   :  { %v847_v33 = vunpack.c.l.b16 %v808_v23  ;;  %v769_v0 = vmax.f32 %v767_v18, %v768_v29  ;;  %v772_v34 = vmax.f32 %v741_v30, %v742_v31  ;;  %v651_v36 = vpop.f32.mrb[16].mxu0 }
 0x1ac   :  { %v697_v58 = vadd.f32 %v1547_v28, %v651_v36  ;;  %v653_v39 = vpop.f32.mrb[17].mxu0 }
 0x1ad   :  { %v855_v41 = vsel %vm854_vm10, %v847_v33, %v846_v32  ;;  %v770_v42 = vrot.slane %v769_v0, 1  ;;  %v773_v43 = vrot.slane %v772_v34, 4  ;;  %v654_v46 = vpop.f32.mrb[18].mxu0 }
 0x1ae   :  { %v713_v47 = vmax.f32 %v697_v58, 0.0  ;;  %v698_v1 = vadd.f32 %v1547_v28, %v654_v46  ;;  %v656_v48 = vpop.f32.mrb[19].mxu0 }
 0x1af   :  { %v771_v49 = vmax.f32 %v769_v0, %v770_v42  ;;  %v774_v3 = vmax.f32 %v772_v34, %v773_v43 }
 0x1b0   :  { %v714_v50 = vmax.f32 %v698_v1, 0.0  ;;  %v743_v53 = vsel %vm1556_vm8, %v713_v47, 0.0 }
 0x1b1   :  { %v809_v51 = vpack.c.bf16 %v771_v49, %v771_v49  ;;  %v775_v52 = vrot.slane %v774_v3, 2 }
 0x1b2   :  { %v744_v54 = vsel %vm1560_vm9, %v714_v50, 0.0 }
 0x1b3   :  { %v848_v20 = vunpack.c.l.b16 %v809_v51  ;;  %v776_v56 = vmax.f32 %v774_v3, %v775_v52  ;;  %v779_v57 = vmax.f32 %v743_v53, %v744_v54  ;;  %v659_v59 = vpop.f32.mrb[20].mxu0 }
 0x1b4   :  { %v699_v60 = vadd.f32 %v1547_v28, %v659_v59  ;;  %v661_v61 = vpop.f32.mrb[21].mxu0 }
 0x1b5   :  { %v777_v44 = vrot.slane %v776_v56, 1  ;;  %v780_v63 = vrot.slane %v779_v57, 4  ;;  %v662_v2 = vpop.f32.mrb[22].mxu0  ;;  %v857_v4 = vsel %vm856_vm11, %v848_v20, %v855_v41 }
 0x1b6   :  { %v715_v5 = vmax.f32 %v699_v60, 0.0  ;;  %v700_v8 = vadd.f32 %v1547_v28, %v662_v2  ;;  %v664_v62 = vpop.f32.mrb[23].mxu0 }
 0x1b7   :  { %v778_v25 = vmax.f32 %v776_v56, %v777_v44  ;;  %v781_v6 = vmax.f32 %v779_v57, %v780_v63 }
 0x1b8   :  { %v716_v45 = vmax.f32 %v700_v8, 0.0  ;;  %v745_v11 = vsel %vm1556_vm8, %v715_v5, 0.0 }
 0x1b9   :  { %v810_v7 = vpack.c.bf16 %v778_v25, %v778_v25  ;;  %v782_v9 = vrot.slane %v781_v6, 2 }
 0x1ba   :  { %v746_v12 = vsel %vm1560_vm9, %v716_v45, 0.0 }
 0x1bb   :  { %v849_v13 = vunpack.c.l.b16 %v810_v7  ;;  %v783_v10 = vmax.f32 %v781_v6, %v782_v9  ;;  %v786_v14 = vmax.f32 %v745_v11, %v746_v12  ;;  %v667_v15 = vpop.f32.mrb[24].mxu0  ;;  %v1036_v9 = vld [vmem:[%s1632_s5] ss:$0 sm:$0xff]  ;;  %s1223_s5 = smov [#allocation8]  }
 0x1bc   :  { %v701_v35 = vadd.f32 %v1547_v28, %v667_v15  ;;  %v669_v16 = vpop.f32.mrb[25].mxu0  ;;  %v961_v15 = vand.u32 127, %v721_v26  ;;  %s990_s14 = sshll.u32 %s1223_s5, 4  ;;  %s991_s14 = int_to_ptr.vmem [resolvable:$true] %s990_s14 }
 0x1bd   :  { %v784_v17 = vrot.slane %v783_v10, 1  ;;  %v787_v24 = vrot.slane %v786_v14, 4  ;;  %v670_v21 = vpop.f32.mrb[26].mxu0  ;;  %v859_v40 = vsel %vm858_vm12, %v849_v13, %v857_v4  ;;  %s1185_s15 = scalar_lea.vmem %s991_s14, 16  ;;  %s1189_s16 = scalar_lea.vmem %s991_s14, 32 }
 0x1be   :  { %v717_v55 = vmax.f32 %v701_v35, 0.0  ;;  %v702_v22 = vadd.f32 %v1547_v28, %v670_v21  ;;  %v672_v18 = vpop.f32.mrb[27].mxu0  ;;  %p1186_p10 = scmp.ne.s32.totalorder %s991_s14, %s1185_s15  ;;  %p1190_p11 = scmp.lt.s32.totalorder %s991_s14, %s991_s14 }
 0x1bf   :  { %v785_v19 = vmax.f32 %v783_v10, %v784_v17  ;;  %v788_v23 = vmax.f32 %v786_v14, %v787_v24  ;;  %p1191_p12 = scmp.lt.s32.totalorder %s1189_s16, %s1185_s15 }
 0x1c0   :  { %v718_v29 = vmax.f32 %v702_v22, 0.0  ;;  %v747_v32 = vsel %vm1556_vm8, %v717_v55, 0.0 }
 0x1c1   :  { %v811_v30 = vpack.c.bf16 %v785_v19, %v785_v19  ;;  %v789_v31 = vrot.slane %v788_v23, 2  ;;  %p1192_p13 = por %p1191_p12, %p1190_p11 }
 0x1c2   :  { %v748_v33 = vsel %vm1560_vm9, %v718_v29, 0.0 }
 0x1c3   :  { %v850_v0 = vunpack.c.l.b16 %v811_v30  ;;  %v790_v34 = vmax.f32 %v788_v23, %v789_v31  ;;  %v793_v36 = vmax.f32 %v747_v32, %v748_v33  ;;  %v675_v58 = vpop.f32.mrb[28].mxu0  ;;  %v980_v23 = vsub.s32 %v961_v15, %v1542_v27  ;;  %p1193_p0 = pnand %p1192_p13, %p1186_p10 }
 0x1c4   :  { %v703_v39 = vadd.f32 %v1547_v28, %v675_v58  ;;  %v677_v41 = vpop.f32.mrb[29].mxu0 }
 0x1c5   :  { %v791_v42 = vrot.slane %v790_v34, 1  ;;  %v794_v43 = vrot.slane %v793_v36, 4  ;;  %v678_v46 = vpop.f32.mrb[30].mxu0  ;;  %v861_v47 = vsel %vm860_vm13, %v850_v0, %v859_v40 }
 0x1c6   :  { %v719_v1 = vmax.f32 %v703_v39, 0.0  ;;  %v704_v48 = vadd.f32 %v1547_v28, %v678_v46  ;;  %v680_v49 = vpop.f32.mrb[31].mxu0 }
 0x1c7   :  { %v792_v3 = vmax.f32 %v790_v34, %v791_v42  ;;  %v795_v50 = vmax.f32 %v793_v36, %v794_v43 }
 0x1c8   :  { %v720_v51 = vmax.f32 %v704_v48, 0.0  ;;  %v749_v54 = vsel %vm1556_vm8, %v719_v1, 0.0 }
 0x1c9   :  { %v812_v52 = vpack.c.bf16 %v792_v3, %v792_v3  ;;  %v796_v53 = vrot.slane %v795_v50, 2 }
 0x1ca   :  { %v750_v20 = vsel %vm1560_vm9, %v720_v51, 0.0 }
 0x1cb   :  { %v851_v56 = vunpack.c.l.b16 %v812_v52  ;;  %v797_v57 = vmax.f32 %v795_v50, %v796_v53  ;;  %v800_v59 = vmax.f32 %v749_v54, %v750_v20 }
 0x1cd   :  { %v798_v60 = vrot.slane %v797_v57, 1  ;;  %v801_v61 = vrot.slane %v800_v59, 4  ;;  %v863_v44 = vsel %vm862_vm14, %v851_v56, %v861_v47 }
 0x1cf   :  { %v799_v28 = vmax.f32 %v797_v57, %v798_v60  ;;  %v802_v63 = vmax.f32 %v800_v59, %v801_v61 }
 0x1d1   :  { %v813_v2 = vpack.c.bf16 %v799_v28, %v799_v28  ;;  %v803_v4 = vrot.slane %v802_v63, 2 }
 0x1d3   :  { %v804_v5 = vmax.f32 %v802_v63, %v803_v4  ;;  %v852_v8 = vunpack.c.l.b16 %v813_v2 }
 0x1d5   :  { %v805_v62 = vrot.slane %v804_v5, 1  ;;  %v865_v37 = vsel %vm864_vm15, %v852_v8, %v863_v44 }
 0x1d7   :  { %v806_v25 = vmax.f32 %v804_v5, %v805_v62 }
 0x1d9   :  { %v814_v6 = vpack.c.bf16 %v806_v25, %v806_v25 }
 0x1db   :  { %v853_v38 = vunpack.c.l.b16 %v814_v6 }
 0x1dd   :  { %v867_v45 = vsel %vm866_vm0, %v853_v38, %v865_v37 }
 0x1de   :  { %v868_v7 = vpack.c.b16 %v867_v45, %v867_v45 }
 0x1e0   :  { %1071 = vmatmul.mubr.bf16.vlgmr.msra.gmra.mrb[0].mxu1 %v868_v7 }
 0x2b3   :  { %v952_v11 = vpop.f32.mrb[0].mxu1 }
 0x2b4   :  { %v953_v12 = vadd.f32 %v1036_v9, %v952_v11  ;;  %v1072_v13 = vpop.f32.mrb[1].mxu1 }
 0x2b5   :  { %v955_v10 = vpop.f32.mrb[2].mxu1 }
 0x2b6   :  { %958 = vmax.xlane.f32.xlu0 %v953_v12  ;;  %v1073_v14 = vpop.f32.mrb[3].mxu1 }
 0x343   :  { %v959_v35 = vpop.xlane.xlu0 %958 }
 0x344   :  { %vm962_vm1 = vcmp.eq.f32.partialorder %v953_v12, %v959_v35 }
 0x345   :  { %v963_v16 = vsel %vm962_vm1, %v961_v15, 1073741824 }
 0x346   :  { %v965_v17 = vshra.s32 %v963_v16, 16  ;;  %v964_v21 = vand.u32 65535, %v963_v16 }
 0x348   :  { %v967_v24 = vcvt.s32.f32 %v965_v17  ;;  %v966_v55 = vcvt.s32.f32 %v964_v21 }
 0x34a   :  { %968 = vmin.xlane.f32.xlu1 %v967_v24 }
 0x3d7   :  { %v969_v40 = vpop.xlane.xlu1 %968 }
 0x3d8   :  { %vm970_vm2 = vcmp.eq.f32.partialorder %v967_v24, %v969_v40  ;;  %v975_v18 = vcvt.f32.s32 %v969_v40 }
 0x3d9   :  { %v971_v22 = vsel %vm970_vm2, %v966_v55, inf }
 0x3da   :  { %972 = vmin.xlane.f32.xlu0 %v971_v22  ;;  %v976_v29 = vshll.u32 %v975_v18, 16 }
 0x467   :  { %v973_v19 = vpop.xlane.xlu0 %972 }
 0x468   :  { %v974_v30 = vcvt.f32.s32 %v973_v19 }
 0x46a   :  { %v977_v26 = vadd.s32 %v976_v29, %v974_v30 }
 0x46c   :  { %v981_v31 = vrot.slane %v977_v26, %v980_v23 }
 0x46e   :  { %983 = vst.msk [vmem:[#allocation8] sm:$0x1] %vm982_vm3, %v981_v31 }
 0x46f   :  { %1196 = shalt.err (!%p1193_p0)
}
 0x470   :  { %s1197_s19 = scalar_lea.hbm %s1633_s6, 16 }
 0x471   :  { %p1198_p1 = scmp.ne.s32.totalorder %s1633_s6, %s1197_s19  ;;  %p1201_p2 = scmp.lt.u32.totalorder %s1197_s19, %s1633_s6 }
 0x473   :  { %p1203_p3 = pnand %p1201_p2, %p1198_p1 }
 0x475   :  { %1206 = shalt.err (!%p1203_p3)
}
 0x476   :  { %993 = dma.vmem_to_hbm [thread:$0]  %s991_s14, 16, %s1633_s6, [#allocation4]  }
 0x477   :  { %1211 = dma.done.wait [#allocation4], 16  }
 0x478   :  { %1212 = vsyncadd [#allocation4], 4294967280 }
 0x479   :  { %997 = vsyncpa [#allocation3], 1 }
 0x47a   :  { %998 = vsyncpa [#allocation6], 1 }
 0x47b   :  { %999 = vsyncpa [#allocation4], 1 }

</bundles_post_ra>
